<compile_context>
chip_gen: v6e
topology: v6e:2x2x1
jax: 0.10.0
libtpu: 0.0.40
codegen_flags: <defaults>
</compile_context>

<pallas_src>
import jax
import jax.numpy as jnp
from jax.experimental import pallas as pl
from jax.experimental.pallas import tpu as pltpu


def _mbert_pooler_kernel(x_ref, m_ref, w_ref, b_ref, drop_ref, out_ref):
    # x_ref    : [TB, S, D] bf16/f32  token embeddings (streamed, double-buffered)
    # m_ref    : [TB, S, 1] f32       attention mask (0/1)
    # w_ref    : [D, H] bf16          resident pooler weight
    # b_ref    : [1, H] f32           resident pooler bias
    # drop_ref : [TB, H] f32          pre-scaled dropout keep mask (1/(1-p) or 0)
    x = x_ref[...].astype(jnp.float32)                      # explicit f32 (v5e: no bf16 VALU)
    m = m_ref[...]                                           # [TB, S, 1]

    # Masked token sum over the sequence axis on the VPU (lane-broadcast multiply,
    # sublane reduce) -- stays hidden under the HBM DMA that bounds this kernel.
    msum = jnp.sum(x * m, axis=1)                            # [TB, D]
    denom = jnp.maximum(jnp.sum(m, axis=1), 1.0)             # [TB, 1]
    pooled = msum / denom                                    # masked mean, f32

    # BERT pooler stand-in: dense + tanh.  bf16 operands, f32 MXU accumulate.
    f = jnp.tanh(
        jnp.dot(pooled.astype(jnp.bfloat16), w_ref[...],
                preferred_element_type=jnp.float32)
        + b_ref[...])                                        # [TB, H]

    # Dropout(0.6): multiply by the pre-scaled keep mask (all-ones in eval).
    out_ref[...] = (f * drop_ref[...]).astype(out_ref.dtype)


def _tpu_vmem_capacity_bytes():
    try:
        return int(pltpu.get_tpu_info().vmem_capacity_bytes)
    except Exception:                                        # CPU / interpret fallback
        return 64 << 20


def _derive_block_batch(B, S, D, x_itemsize, budget_bytes):
    # Dominant per-batch-row VMEM cost: double-buffered x tile + f32 compute temps.
    per_row = S * D * (2 * x_itemsize + 4)
    tb = max(8, (budget_bytes // max(per_row, 1)) // 8 * 8)
    if B > 8:
        # keep >= 2 grid steps so v7x can shard the "parallel" batch axis over 2 TCs
        half = (((B + 1) // 2) + 7) // 8 * 8
        tb = min(tb, max(8, half))
    tb = min(tb, ((B + 7) // 8) * 8)
    return int(max(8, tb))


def mbert_base_d(text_embeddings, attention_mask, token_type_ids, params, *,
                 train=False, dropout_p=0.6, rng_seed=0, block_batch=None):
    """Forward pass of mBERTBaseD: pooled encoder output -> Dropout(0.6).

    token_type_ids is accepted for API parity with the torch module; the
    stand-in encoder does not consume it.
    """
    # TODO(synk): the pretrained mBERT trunk (embedding lookup + 12 transformer
    # layers) is an external black box and is not reproduced here; the kernel
    # implements the pooler head (masked mean pool -> dense -> tanh) plus the
    # Dropout(0.6) that mBERTBaseD itself owns.
    del token_type_ids

    B, S, D = text_embeddings.shape
    w = params["w_pool"].astype(jnp.bfloat16)     # bf16 operands for the MXU fast path
    b = params["b_pool"].astype(jnp.float32)
    H = w.shape[1]

    x = text_embeddings                           # stream in the producer's dtype
    m = attention_mask.astype(jnp.float32)[:, :, None]       # [B, S, 1], tiny

    if train:
        keep = jax.random.bernoulli(jax.random.PRNGKey(rng_seed),
                                    p=1.0 - dropout_p, shape=(B, H))
        drop = keep.astype(jnp.float32) * (1.0 / (1.0 - dropout_p))
    else:
        drop = jnp.ones((B, H), jnp.float32)

    x_itemsize = jnp.dtype(x.dtype).itemsize
    vmem_cap = _tpu_vmem_capacity_bytes()
    budget = max(16 << 20, int(vmem_cap * 0.45))  # ~28 MiB on v7x, ~57 MiB on v5e/v6e

    if block_batch is None:
        TB = _derive_block_batch(B, S, D, x_itemsize, budget)
    else:
        TB = max(8, (int(block_batch) // 8) * 8)
    TB = max(8, min(TB, ((B + 7) // 8) * 8))
    n_tiles = pl.cdiv(B, TB)

    # Real footprint: double-buffered streamed tiles + resident weights + f32 temps
    # + compiler scratch headroom, clamped below physical VMEM.
    tile_bytes = 2 * (TB * S * D * x_itemsize    # x (double-buffered)
                      + TB * S * 4               # mask
                      + TB * H * 4               # dropout keep mask
                      + TB * H * 4)              # output tile
    resident_bytes = 2 * (D * H * 2 + H * 4)     # w / b (double-buffered by Pallas)
    temp_bytes = TB * S * D * 4                  # f32 masked-sum temporaries
    vmem_limit = int(min(max(tile_bytes + resident_bytes + temp_bytes + (4 << 20),
                             16 << 20),
                         max(32 << 20, vmem_cap - (16 << 20))))

    out = pl.pallas_call(
        _mbert_pooler_kernel,
        out_shape=jax.ShapeDtypeStruct((B, H), jnp.float32),
        grid_spec=pltpu.PrefetchScalarGridSpec(
            num_scalar_prefetch=0,
            grid=(n_tiles,),
            in_specs=[
                pl.BlockSpec((TB, S, D), lambda i: (i, 0, 0)),   # embeddings
                pl.BlockSpec((TB, S, 1), lambda i: (i, 0, 0)),   # attention mask
                pl.BlockSpec((D, H),     lambda i: (0, 0)),      # pooler weight (resident)
                pl.BlockSpec((1, H),     lambda i: (0, 0)),      # pooler bias (resident)
                pl.BlockSpec((TB, H),    lambda i: (i, 0)),      # dropout keep mask
            ],
            out_specs=pl.BlockSpec((TB, H), lambda i: (i, 0)),
        ),
        compiler_params=pltpu.CompilerParams(
            dimension_semantics=("parallel",),
            vmem_limit_bytes=vmem_limit),
    )(x, m, w, b, drop)

    return out


def init_params(key, d_model, hidden):
    k1, k2 = jax.random.split(key)
    scale = 0.05
    return {
        "w_pool": scale * jax.random.normal(k1, (d_model, hidden), jnp.float32),
        "b_pool": scale * jax.random.normal(k2, (1, hidden), jnp.float32),
    }


def _reference(text_embeddings, attention_mask, params):
    # pure-JAX reference (eval mode: dropout is identity)
    x = text_embeddings.astype(jnp.float32)
    m = attention_mask.astype(jnp.float32)
    denom = jnp.maximum(jnp.sum(m, axis=1, keepdims=True), 1.0)
    pooled = jnp.sum(x * m[:, :, None], axis=1) / denom
    return jnp.tanh(pooled @ params["w_pool"].astype(jnp.float32) + params["b_pool"])


if __name__ == "__main__":
    B, S, D, H = 32, 16, 128, 128   # batch, seq len, embed dim, pooler hidden
    P_DROP = 0.6

    key = jax.random.PRNGKey(0)
    k_x, k_m, k_p = jax.random.split(key, 3)

    text_embeddings = jax.random.normal(k_x, (B, S, D), jnp.float32).astype(jnp.bfloat16)
    attention_mask = (jax.random.uniform(k_m, (B, S)) > 0.2).astype(jnp.int32)
    token_type_ids = jnp.zeros((B, S), jnp.int32)
    params = init_params(k_p, D, H)

    # Eval mode (dropout identity, like torch .eval()): numerical parity check.
    out_eval = mbert_base_d(text_embeddings, attention_mask, token_type_ids,
                            params, train=False, dropout_p=P_DROP, block_batch=8)
    out_eval = jax.block_until_ready(out_eval)
    ref = _reference(text_embeddings, attention_mask, params)
    assert out_eval.shape == (B, H)
    assert jnp.allclose(out_eval, ref, atol=2e-2, rtol=2e-2), \
        float(jnp.max(jnp.abs(out_eval - ref)))

    # Train mode: Dropout(0.6) active via a pre-scaled keep mask.
    out_train = mbert_base_d(text_embeddings, attention_mask, token_type_ids,
                             params, train=True, dropout_p=P_DROP,
                             rng_seed=123, block_batch=8)
    out_train = jax.block_until_ready(out_train)
    kept = out_train != 0.0
    # Survivors are scaled by 1/(1-p); dropped entries are exactly zero.
    assert jnp.allclose(jnp.where(kept, out_train, 0.0),
                        jnp.where(kept, out_eval / (1.0 - P_DROP), 0.0),
                        atol=2e-4, rtol=2e-4)
    keep_frac = float(jnp.mean(kept.astype(jnp.float32)))
    assert 0.28 < keep_frac < 0.52, keep_frac

    print("KERNEL_OK")
</pallas_src>

<mosaic_0001>
module attributes {stable_mosaic.version = 11 : i64} {
  func.func @_mbert_pooler_kernel(%arg0: i32, %arg1: memref<8x16x128xbf16, #tpu.memory_space<vmem>>, %arg2: memref<8x16x1xf32, #tpu.memory_space<vmem>>, %arg3: memref<128x128xbf16, #tpu.memory_space<vmem>>, %arg4: memref<1x128xf32, #tpu.memory_space<vmem>>, %arg5: memref<8x128xf32, #tpu.memory_space<vmem>>, %arg6: memref<8x128xf32, #tpu.memory_space<vmem>>) attributes {dimension_semantics = [#tpu.dimension_semantics<parallel>], iteration_bounds = array<i64: 4>, scalar_prefetch = 0 : i64, scratch_operands = 0 : i64, tpu.core_type = #tpu.core_type<tc>, window_params = [{transform_indices = @transform_0, window_bounds = array<i64: 8, 16, 128>}, {transform_indices = @transform_1, window_bounds = array<i64: 8, 16, 1>}, {pipeline_mode = #tpu.pipeline_mode<synchronous>, transform_indices = @transform_2, window_bounds = array<i64: 128, 128>}, {pipeline_mode = #tpu.pipeline_mode<synchronous>, transform_indices = @transform_3, window_bounds = array<i64: 1, 128>}, {transform_indices = @transform_4, window_bounds = array<i64: 8, 128>}, {transform_indices = @transform_5, window_bounds = array<i64: 8, 128>}]} {
    %c0 = arith.constant 0 : index
    %c0_0 = arith.constant 0 : index
    %c0_1 = arith.constant 0 : index
    %0 = vector.load %arg1[%c0, %c0_0, %c0_1] : memref<8x16x128xbf16, #tpu.memory_space<vmem>>, vector<8x16x128xbf16>
    %1 = arith.extf %0 : vector<8x16x128xbf16> to vector<8x16x128xf32>
    %c0_2 = arith.constant 0 : index
    %c0_3 = arith.constant 0 : index
    %c0_4 = arith.constant 0 : index
    %2 = vector.load %arg2[%c0_2, %c0_3, %c0_4] : memref<8x16x1xf32, #tpu.memory_space<vmem>>, vector<8x16x1xf32>
    %3 = vector.broadcast %2 : vector<8x16x1xf32> to vector<8x16x128xf32>
    %4 = arith.mulf %1, %3 : vector<8x16x128xf32>
    %cst = arith.constant dense<0.000000e+00> : vector<8x128xf32>
    %5 = vector.multi_reduction <add>, %4, %cst [1] : vector<8x16x128xf32> to vector<8x128xf32>
    %cst_5 = arith.constant dense<0.000000e+00> : vector<8x1xf32>
    %6 = vector.multi_reduction <add>, %2, %cst_5 [1] : vector<8x16x1xf32> to vector<8x1xf32>
    %cst_6 = arith.constant 1.000000e+00 : f32
    %7 = vector.broadcast %cst_6 : f32 to vector<8x1xf32>
    %8 = arith.maximumf %6, %7 : vector<8x1xf32>
    %9 = vector.broadcast %8 : vector<8x1xf32> to vector<8x128xf32>
    %10 = arith.divf %5, %9 : vector<8x128xf32>
    %11 = arith.truncf %10 : vector<8x128xf32> to vector<8x128xbf16>
    %c0_7 = arith.constant 0 : index
    %c0_8 = arith.constant 0 : index
    %12 = vector.load %arg3[%c0_7, %c0_8] : memref<128x128xbf16, #tpu.memory_space<vmem>>, vector<128x128xbf16>
    %cst_9 = arith.constant dense<0.000000e+00> : vector<8x128xf32>
    %13 = tpu.matmul %11, %12, %cst_9 {dimension_numbers = #tpu.dot_dimension_numbers<[1], [0], [0], [1], [0, 0, 1, 1], [], []>} : vector<8x128xbf16>, vector<128x128xbf16>, vector<8x128xf32> -> vector<8x128xf32>
    %c0_10 = arith.constant 0 : index
    %c0_11 = arith.constant 0 : index
    %14 = vector.load %arg4[%c0_10, %c0_11] : memref<1x128xf32, #tpu.memory_space<vmem>>, vector<1x128xf32>
    %15 = vector.broadcast %14 : vector<1x128xf32> to vector<8x128xf32>
    %16 = arith.addf %13, %15 : vector<8x128xf32>
    %17 = math.tanh %16 : vector<8x128xf32>
    %c0_12 = arith.constant 0 : index
    %c0_13 = arith.constant 0 : index
    %18 = vector.load %arg5[%c0_12, %c0_13] : memref<8x128xf32, #tpu.memory_space<vmem>>, vector<8x128xf32>
    %19 = arith.mulf %17, %18 : vector<8x128xf32>
    %c0_14 = arith.constant 0 : index
    %c0_15 = arith.constant 0 : index
    %20 = vector.load %arg6[%c0_14, %c0_15] : memref<8x128xf32, #tpu.memory_space<vmem>>, vector<8x128xf32>
    tpu.vector_store %arg6[%c0_14, %c0_15], %19 {strides = array<i32>} : memref<8x128xf32, #tpu.memory_space<vmem>>, vector<8x128xf32>,
    return
  }
  func.func @transform_0(%arg0: i32) -> (i32, i32, i32) {
    %c0_i32 = arith.constant 0 : i32
    %c0_i32_0 = arith.constant 0 : i32
    %c0_i32_1 = arith.constant 0 : i32
    return %arg0, %c0_i32, %c0_i32_0 : i32, i32, i32
  }
  func.func @transform_1(%arg0: i32) -> (i32, i32, i32) {
    %c0_i32 = arith.constant 0 : i32
    %c0_i32_0 = arith.constant 0 : i32
    %c0_i32_1 = arith.constant 0 : i32
    return %arg0, %c0_i32, %c0_i32_0 : i32, i32, i32
  }
  func.func @transform_2(%arg0: i32) -> (i32, i32) {
    %c0_i32 = arith.constant 0 : i32
    %c0_i32_0 = arith.constant 0 : i32
    %c0_i32_1 = arith.constant 0 : i32
    return %c0_i32, %c0_i32_0 : i32, i32
  }
  func.func @transform_3(%arg0: i32) -> (i32, i32) {
    %c0_i32 = arith.constant 0 : i32
    %c0_i32_0 = arith.constant 0 : i32
    %c0_i32_1 = arith.constant 0 : i32
    return %c0_i32, %c0_i32_0 : i32, i32
  }
  func.func @transform_4(%arg0: i32) -> (i32, i32) {
    %c0_i32 = arith.constant 0 : i32
    %c0_i32_0 = arith.constant 0 : i32
    return %arg0, %c0_i32 : i32, i32
  }
  func.func @transform_5(%arg0: i32) -> (i32, i32) {
    %c0_i32 = arith.constant 0 : i32
    %c0_i32_0 = arith.constant 0 : i32
    return %arg0, %c0_i32 : i32, i32
  }
}

</mosaic_0001>

<bundles_post_ra>
// kernel: tpu_custom_call.1
= control target key start
LH: loop header
LB: loop body
LE: loop exit
PB: predicated region body
PF: predicated region fallthrough
CT: control target
= control target key end

     0   :  { %10 = vsyncpa [#allocation3], 0  ;;  %s1310_s0 = inlined_call_operand.vmem [shape: bf16[32,16,128], index: 0, kind: input, shape index: {}]   ;;  %s1311_s1 = inlined_call_operand.vmem [shape: f32[32,16,1], index: 1, kind: input, shape index: {}]   ;;  %s1312_s2 = inlined_call_operand.vmem [shape: bf16[128,128], index: 2, kind: input, shape index: {}]   ;;  %s1313_s3 = inlined_call_operand.vmem [shape: f32[1,128], index: 3, kind: input, shape index: {}]   ;;  %s1314_s4 = inlined_call_operand.vmem [shape: f32[32,128], index: 4, kind: input, shape index: {}]   ;;  %s1315_s5 = inlined_call_operand.hbm [shape: f32[32,128], index: 5, kind: output, shape index: {}]  }
   0x1   :  { %12 = vsyncpa [#allocation3 + $0x1], 0  ;;  %s1121_s18 = smov 0   ;;  %s1123_s19 = smov 0  }
   0x2   :  { %s1125_s20 = smov 0   ;;  %s1127_s21 = smov 0  }
   0x3 LB: > { %s1142_s22 = sadd.s32 4294967295, %s1085_s21   ;;  %s860_s23 = sadd.s32 4294967294, %s1085_s21   ;;  %s1085_s21 = sphi %s1127_s21, %s1321_s21   ;;  %s1081_s20 = sphi %s1125_s20, %s1320_s20   ;;  %s1077_s19 = sphi %s1123_s19, %s1319_s19   ;;  %s1073_s18 = sphi %s1121_s18, %s1318_s18  }
   0x4   : > { %s1146_s24 = sadd.s32 1, %s1085_s21   ;;  %s145_s25 = sadd.s32 1, %s1081_s20 }
   0x5   : > { %s142_s26 = ssub.s32 %s1085_s21, %s1146_s24  ;;  %p155_p0 = scmp.ne.s32.totalorder %s1081_s20, %s1077_s19 }
   0x6   : > { %p143_p1 = scmp.eq.s32.totalorder %s142_s26, 0  ;;  %p156_p2 = scmp.eq.s32.totalorder %s1142_s22, 3 }
   0x7   : > { %p161_p3 = scmp.ne.s32.totalorder %s1077_s19, %s1073_s18  ;;  %p162_p4 = scmp.eq.s32.totalorder %s860_s23, 3 }
   0x8   : > { %s1157_s27 = scalar_select %p143_p1, %s1081_s20, %s145_s25  }
   0x9   : > { %p1159_p5 = por %p156_p2, %p155_p0  ;;  %p1163_p6 = por %p162_p4, %p161_p3 }
   0xa   : > { %p863_p7 = scmp.ge.s32.totalorder %s1085_s21, 1  ;;  %p213_p8 = scmp.lt.s32.totalorder %s1085_s21, 5 }
   0xc   : > { %p214_p9 = pnand %p863_p7, %p213_p8 }
   0xd   : > { %s865_s30 = sshll.u32 (!%p214_p9), %s1142_s22, 3  ;;  %p266_p11 = scmp.lt.s32.totalorder (!%p214_p9), %s1142_s22, 3 }
   0xe   : > { %217 = sbr.rel (%p214_p9) target bundleno = 440 (0x1b8), region = 40  ;;  %p253_p10 = scmp.lt.s32.totalorder (!%p214_p9), %s865_s30, 31 }
   0xf   : > { %s249_s17 = sand.u32 (!%p214_p9), 1, %s1077_s19   ;;  %s882_s8 = sshll.u32 (!%p214_p9), %s1142_s22, 7 }
  0x10   : > { %s864_s23 = sshll.u32 (!%p214_p9), %s249_s17, 3  ;;  %s775_s13 = scalar_lea.hbm (!%p214_p9), %s1315_s5, %s882_s8 }
  0x11   : > { %s1090_s15 = smov (!%p214_p9), [#allocation2]  }
  0x13   : > { %v1087_v0 = vmov 0   ;;  %s1323_s30 = smov (!%p253_p10, %s865_s30), 31  ;;  %vm471_vm0 = vcmask 7168   ;;  %vm1089_vm1 = vmmov 0   ;;  %vm655_vm2 = vcmask 1041409  }
  0x14   : > { %998 = vset.pattern.permute.xlu1 %v1087_v0  ;;  %997 = vset.pattern.permute.xlu0 %v1087_v0  ;;  %s886_s6 = sshll.u32 %s1323_s30, 4  ;;  %s885_s11 = sshll.u32 %s1323_s30, 3  ;;  %vm657_vm3 = vcmask 1042434   ;;  %vm659_vm4 = vcmask 1043459   ;;  %vm661_vm5 = vcmask 1044484   ;;  %vm663_vm6 = vcmask 1045509  }
  0x15   : > { %s1176_s9 = scalar_lea.vmem %s1311_s1, %s886_s6  ;;  %s1258_s14 = scalar_lea.vmem %s1310_s0, %s885_s11  ;;  %vm665_vm7 = vcmask 1046534   ;;  %vm667_vm8 = vcmask 1047559  }
  0x16   : > { %v305_v1 = vld [vmem:[%s1176_s9 + $0x10] sm:$0xff]  ;;  %v303_v2 = vld [vmem:[%s1176_s9] sm:$0xff]  ;;  %v306_v3 = vld [vmem:[%s1176_s9 + $0x18] sm:$0xff]  ;;  %s267_s16 = scalar_select %p266_p11, %s1142_s22, 3 }
  0x17   : > { %331 = vperm.xlu1 %998, %v305_v1   ;;  %v481_v4 = vsel %vm471_vm0, %v305_v1, 0.0  ;;  %321 = vperm.xlu0 %997, %v303_v2   ;;  %v472_v5 = vsel %vm471_vm0, %v303_v2, 0.0  ;;  %v482_v6 = vsel %vm471_vm0, %v306_v3, 0.0  ;;  %v304_v7 = vld [vmem:[%s1176_s9 + $0x8] sm:$0xff]  ;;  %v307_v9 = vld [vmem:[%s1176_s9 + $0x20] sm:$0xff]  ;;  %v310_v14 = vld [vmem:[%s1176_s9 + $0x38] sm:$0xff] }
  0x18   : > { %v308_v8 = vld [vmem:[%s1176_s9 + $0x28] sm:$0xff]  ;;  %v483_v10 = vadd.f32 %v482_v6, %v481_v4  ;;  %v473_v11 = vsel %vm471_vm0, %v304_v7, 0.0  ;;  %v490_v13 = vsel %vm471_vm0, %v307_v9, 0.0  ;;  %v309_v15 = vld [vmem:[%s1176_s9 + $0x30] sm:$0xff]  ;;  %v500_v18 = vsel %vm471_vm0, %v310_v14, 0.0  ;;  %v311_v21 = vld [vmem:[%s1176_s9 + $0x40] sm:$0xff] }
  0x19   : > { %v491_v12 = vsel %vm471_vm0, %v308_v8, 0.0  ;;  %v474_v16 = vadd.f32 %v473_v11, %v472_v5  ;;  %v499_v19 = vsel %vm471_vm0, %v309_v15, 0.0  ;;  %v312_v20 = vld [vmem:[%s1176_s9 + $0x48] sm:$0xff]  ;;  %v1197_v22 = vld [vmem:[%s1176_s9 + $0x58] sm:$0xff]  ;;  %v508_v26 = vsel %vm471_vm0, %v311_v21, 0.0  ;;  %v313_v27 = vld [vmem:[%s1176_s9 + $0x50] sm:$0xff] }
  0x1a   : > { %v492_v17 = vadd.f32 %v491_v12, %v490_v13  ;;  %v484_v23 = vrot.slane %v483_v10, 4  ;;  %v501_v24 = vadd.f32 %v500_v18, %v499_v19  ;;  %v509_v25 = vsel %vm471_vm0, %v312_v20, 0.0  ;;  %v1206_v35 = vld [vmem:[%s1176_s9 + $0x68] sm:$0xff]  ;;  %v1209_v36 = vld [vmem:[%s1176_s9 + $0x60] sm:$0xff]  ;;  %v1212_v39 = vld [vmem:[%s1176_s9 + $0x70] sm:$0xff]  ;;  %s871_s25 = sshll.u32 %s267_s16, 3 }
  0x1b   : > { %336 = vperm.xlu1 %998, %v306_v3   ;;  %326 = vperm.xlu0 %997, %v304_v7   ;;  %v475_v28 = vrot.slane %v474_v16, 4  ;;  %v510_v30 = vadd.f32 %v509_v25, %v508_v26  ;;  %v517_v31 = vsel %vm471_vm0, %v313_v27, 0.0  ;;  %v518_v34 = vsel %vm471_vm0, %v1197_v22, 0.0  ;;  %v1215_v40 = vld [vmem:[%s1176_s9 + $0x78] sm:$0xff]  ;;  %s269_s7 = scalar_lea.vmem %s1314_s4, %s871_s25  ;;  %s251_s9 = scalar_lea.vmem [#allocation2], %s864_s23 }
  0x1c   : > { %v493_v29 = vrot.slane %v492_v17, 4  ;;  %v485_v32 = vadd.f32 %v484_v23, %v483_v10  ;;  %v502_v33 = vrot.slane %v501_v24, 4  ;;  %v519_v44 = vadd.f32 %v518_v34, %v517_v31  ;;  %s777_s10 = sshll.u32 %s251_s9, 4  ;;  %s1029_s16 = sshll.u32 %s1090_s15, 4  ;;  %s778_s10 = int_to_ptr.vmem [resolvable:$true] %s777_s10  ;;  %s1030_s16 = int_to_ptr.vmem [resolvable:$false] %s1029_s16 }
  0x1d   : > { %v476_v37 = vadd.f32 %v475_v28, %v474_v16  ;;  %v511_v43 = vrot.slane %v510_v30, 4  ;;  %v527_v47 = vsel %vm471_vm0, %v1206_v35, 0.0  ;;  %v526_v48 = vsel %vm471_vm0, %v1209_v36, 0.0  ;;  %s1025_s30 = scalar_lea.vmem %s778_s10, 128  ;;  %s1031_s22 = scalar_lea.vmem %s1030_s16, 256 }
  0x1e   : > { %v494_v38 = vadd.f32 %v493_v29, %v492_v17  ;;  %v486_v41 = vrot.slane %v485_v32, 2  ;;  %v503_v42 = vadd.f32 %v502_v33, %v501_v24  ;;  %v535_v51 = vsel %vm471_vm0, %v1212_v39, 0.0  ;;  %v999_v29 = vld [vmem:[%s1312_s2 + $0x38] sm:$0xff]   ;;  %v1000_v33 = vld [vmem:[%s1312_s2 + $0x30] sm:$0xff]   ;;  %p1026_p12 = scmp.ne.s32.totalorder %s778_s10, %s1025_s30  ;;  %p1032_p1 = scmp.lt.s32.totalorder %s778_s10, %s1030_s16 }
  0x1f   : > { %v477_v45 = vrot.slane %v476_v37, 2  ;;  %346 = vperm.xlu1 %998, %v308_v8   ;;  %341 = vperm.xlu0 %997, %v307_v9   ;;  %v536_v52 = vsel %vm471_vm0, %v1215_v40, 0.0  ;;  %v512_v55 = vadd.f32 %v511_v43, %v510_v30  ;;  %v520_v57 = vrot.slane %v519_v44, 4  ;;  %p1033_p2 = scmp.lt.s32.totalorder %s1031_s22, %s1025_s30 }
  0x20   : > { %v495_v46 = vrot.slane %v494_v38, 2  ;;  %v504_v49 = vrot.slane %v503_v42, 2  ;;  %v487_v50 = vadd.f32 %v486_v41, %v485_v32  ;;  %v528_v58 = vadd.f32 %v527_v47, %v526_v48  ;;  %v1006_v41 = vld [vmem:[%s1312_s2] sm:$0xff]   ;;  %v919_v48 = vld [vmem:[%s1258_s14 + $0x8] sm:$0xff]   ;;  %p1027_p13 = pnand %p1026_p12, %p1159_p5 }
  0x21   : > { %v478_v53 = vadd.f32 %v477_v45, %v476_v37  ;;  %v537_v62 = vadd.f32 %v536_v52, %v535_v51  ;;  %v513_v0 = vrot.slane %v512_v55, 2  ;;  %v521_v2 = vadd.f32 %v520_v57, %v519_v44  ;;  %v1002_v37 = vld [vmem:[%s1312_s2 + $0x20] sm:$0xff]   ;;  %p1034_p3 = por %p1033_p2, %p1032_p1 }
  0x22   : > { %v496_v54 = vadd.f32 %v495_v46, %v494_v38  ;;  %v488_v56 = vrot.slane %v487_v50, 1  ;;  %v505_v61 = vadd.f32 %v504_v49, %v503_v42  ;;  %v529_v3 = vrot.slane %v528_v58, 4  ;;  %v1003_v38 = vld [vmem:[%s1312_s2 + $0x18] sm:$0xff]   ;;  %p1028_p0 = pneg %p1027_p13 }
  0x23   : > { %356 = vperm.xlu1 %998, %v310_v14   ;;  %351 = vperm.xlu0 %997, %v309_v15   ;;  %v479_v59 = vrot.slane %v478_v53, 1  ;;  %v538_v7 = vrot.slane %v537_v62, 4  ;;  %v522_v8 = vrot.slane %v521_v2, 2  ;;  %v514_v10 = vadd.f32 %v513_v0, %v512_v55  ;;  %v888_v55 = vld [vmem:[%s1258_s14] sm:$0xff]  }
  0x24   : > { %v497_v60 = vrot.slane %v496_v54, 1  ;;  %v489_v1 = vadd.f32 %v488_v56, %v487_v50  ;;  %v506_v6 = vrot.slane %v505_v61, 1  ;;  %v530_v9 = vadd.f32 %v529_v3, %v528_v58  ;;  %v922_v58 = vld [vmem:[%s1258_s14 + $0x20] sm:$0xff]   ;;  %p1035_p4 = pnand %p1034_p3, %p1028_p0 }
  0x25   : > { %v480_v63 = vadd.f32 %v479_v59, %v478_v53  ;;  %v539_v14 = vadd.f32 %v538_v7, %v537_v62  ;;  %v515_v15 = vrot.slane %v514_v10, 1  ;;  %v523_v18 = vadd.f32 %v522_v8, %v521_v2  ;;  %v920_v53 = vld [vmem:[%s1258_s14 + $0x10] sm:$0xff]  }
  0x26   : > { %v498_v5 = vadd.f32 %v497_v60, %v496_v54  ;;  %v545_v11 = vmax.f32 %v489_v1, 1.0  ;;  %v507_v13 = vadd.f32 %v506_v6, %v505_v61  ;;  %v531_v17 = vrot.slane %v530_v9, 2  ;;  %v921_v54 = vld [vmem:[%s1258_s14 + $0x18] sm:$0xff]  }
  0x27   : > { %366 = vperm.xlu1 %998, %v312_v20   ;;  %361 = vperm.xlu0 %997, %v311_v21   ;;  %v544_v4 = vmax.f32 %v480_v63, 1.0  ;;  %v540_v19 = vrot.slane %v539_v14, 2  ;;  %v516_v20 = vadd.f32 %v515_v15, %v514_v10  ;;  %v524_v21 = vrot.slane %v523_v18, 1 }
  0x28   : > { %v546_v12 = vmax.f32 %v498_v5, 1.0  ;;  %v547_v16 = vmax.f32 %v507_v13, 1.0  ;;  %v532_v24 = vadd.f32 %v531_v17, %v530_v9  ;;  %v1088_v30 = vmov 0.0  }
  0x29   : > { %v541_v23 = vadd.f32 %v540_v19, %v539_v14  ;;  %v548_v25 = vmax.f32 %v516_v20, 1.0  ;;  %v525_v26 = vadd.f32 %v524_v21, %v523_v18  ;;  %935 = vmatprep.subr.bf16.mxu0 %v1088_v30  ;;  %951 = vmatprep.mubr.msk.bf16.mxu0 %vm1089_vm1, %v1088_v30  ;;  %v894_v49 = vunpack.c.h.bf16 %v919_v48 }
  0x2a   : > { %v533_v28 = vrot.slane %v532_v24, 1  ;;  %936 = vmatpush3.bf16.msra.mxu0 %v999_v29  ;;  %v893_v52 = vunpack.c.l.bf16 %v919_v48  ;;  %v890_v57 = vunpack.c.h.bf16 %v888_v55  ;;  %v898_v59 = vunpack.c.h.bf16 %v920_v53 }
  0x2b   : > { %371 = vperm.xlu1 %998, %v313_v27   ;;  %554 = vperm.xlu0 %997, %v544_v4   ;;  %v542_v27 = vrot.slane %v541_v23, 1  ;;  %v897_v60 = vunpack.c.l.bf16 %v920_v53  ;;  %v902_v61 = vunpack.c.h.bf16 %v921_v54  ;;  %v901_v62 = vunpack.c.l.bf16 %v921_v54 }
  0x2c   : > { %937 = vmatprep.subr.bf16.mxu0 %v1088_v30  ;;  %v534_v32 = vadd.f32 %v533_v28, %v532_v24  ;;  %v889_v2 = vunpack.c.l.bf16 %v888_v55  ;;  %v906_v3 = vunpack.c.h.bf16 %v922_v58  ;;  %v905_v4 = vunpack.c.l.bf16 %v922_v58 }
  0x2d   : > { %v543_v31 = vadd.f32 %v542_v27, %v541_v23  ;;  %v924_v27 = vld [vmem:[%s1258_s14 + $0x30] sm:$0xff]  }
  0x2e   : > { %938 = vmatpush3.bf16.msra.mxu0 %v1000_v33 }
  0x2f   : > { %559 = vperm.xlu1 %998, %v545_v11   ;;  %564 = vperm.xlu0 %997, %v546_v12   ;;  %v551_v34 = vmax.f32 %v543_v31, 1.0 }
  0x30   : > { %939 = vmatprep.subr.bf16.mxu0 %v1088_v30 }
  0x33   : > { %569 = vperm.xlu1 %998, %v547_v16   ;;  %376 = vperm.xlu0 %997, %v1197_v22   ;;  %v549_v22 = vmax.f32 %v525_v26, 1.0  ;;  %v923_v16 = vld [vmem:[%s1258_s14 + $0x28] sm:$0xff]  }
  0x34   : > { %v909_v24 = vunpack.c.l.bf16 %v923_v16 }
  0x37   : > { %386 = vperm.xlu1 %998, %v1206_v35   ;;  %381 = vperm.xlu0 %997, %v1209_v36   ;;  %v550_v35 = vmax.f32 %v534_v32, 1.0  ;;  %v1001_v36 = vld [vmem:[%s1312_s2 + $0x28] sm:$0xff]  }
  0x38   : > { %940 = vmatpush3.bf16.msra.mxu0 %v1001_v36  ;;  %v913_v36 = vunpack.c.l.bf16 %v924_v27 }
  0x39   : > { %941 = vmatprep.subr.bf16.mxu0 %v1088_v30 }
  0x3b   : > { %391 = vperm.xlu1 %998, %v1212_v39   ;;  %574 = vperm.xlu0 %997, %v548_v25   ;;  %v1004_v39 = vld [vmem:[%s1312_s2 + $0x10] sm:$0xff]   ;;  %v910_v25 = vunpack.c.h.bf16 %v923_v16 }
  0x3c   : > { %942 = vmatpush3.bf16.msra.mxu0 %v1002_v37 }
  0x3d   : > { %943 = vmatprep.subr.bf16.mxu0 %v1088_v30 }
  0x3f   : > { %579 = vperm.xlu1 %998, %v549_v22   ;;  %396 = vperm.xlu0 %997, %v1215_v40   ;;  %v1005_v40 = vld [vmem:[%s1312_s2 + $0x8] sm:$0xff]  }
  0x40   : > { %944 = vmatpush3.bf16.msra.mxu0 %v1003_v38 }
  0x41   : > { %945 = vmatprep.subr.bf16.mxu0 %v1088_v30 }
  0x43   : > { %589 = vperm.xlu1 %998, %v551_v34   ;;  %584 = vperm.xlu0 %997, %v550_v35   ;;  %v914_v35 = vunpack.c.h.bf16 %v924_v27 }
  0x44   : > { %946 = vmatpush3.bf16.msra.mxu0 %v1004_v39 }
  0x45   : > { %947 = vmatprep.subr.bf16.mxu0 %v1088_v30 }
  0x48   : > { %948 = vmatpush3.bf16.msra.mxu0 %v1005_v40 }
  0x49   : > { %949 = vmatprep.subr.bf16.mxu0 %v1088_v30 }
  0x4c   : > { %950 = vmatpush3.bf16.msra.mxu0 %v1006_v41 }
  0x92   : > { %v332_v42 = vpop.permute.xlu1 %331  ;;  %v322_v43 = vpop.permute.xlu0 %321 }
  0x93   : > { %v401_v1 = vmul.f32 %v893_v52, %v332_v42  ;;  %v399_v13 = vmul.f32 %v889_v2, %v322_v43 }
  0x96   : > { %v337_v44 = vpop.permute.xlu1 %336  ;;  %v327_v45 = vpop.permute.xlu0 %326 }
  0x97   : > { %v402_v56 = vmul.f32 %v894_v49, %v337_v44  ;;  %v400_v6 = vmul.f32 %v890_v57, %v327_v45  ;;  %v925_v49 = vld [vmem:[%s1258_s14 + $0x38] sm:$0xff]   ;;  %s764_s14 = scalar_lea.sflag [#allocation3], %s249_s17 }
  0x98   : > { %v917_v58 = vunpack.c.l.bf16 %v925_v49 }
  0x99   : > { %v422_v5 = vadd.f32 %v402_v56, %v401_v1  ;;  %v415_v17 = vadd.f32 %v400_v6, %v399_v13 }
  0x9a   : > { %v347_v46 = vpop.permute.xlu1 %346  ;;  %v342_v47 = vpop.permute.xlu0 %341 }
  0x9b   : > { %v404_v7 = vmul.f32 %v898_v59, %v347_v46  ;;  %v403_v8 = vmul.f32 %v897_v60, %v342_v47  ;;  %v423_v18 = vrot.slane %v422_v5, 4  ;;  %v416_v28 = vrot.slane %v415_v17, 4 }
  0x9d   : > { %v429_v19 = vadd.f32 %v404_v7, %v403_v8  ;;  %v424_v29 = vadd.f32 %v423_v18, %v422_v5  ;;  %v417_v38 = vadd.f32 %v416_v28, %v415_v17 }
  0x9e   : > { %v357_v50 = vpop.permute.xlu1 %356  ;;  %v352_v51 = vpop.permute.xlu0 %351 }
  0x9f   : > { %v406_v9 = vmul.f32 %v902_v61, %v357_v50  ;;  %v405_v10 = vmul.f32 %v901_v62, %v352_v51  ;;  %v430_v30 = vrot.slane %v429_v19, 4  ;;  %v425_v40 = vrot.slane %v424_v29, 2 }
  0xa0   : > { %v418_v50 = vrot.slane %v417_v38, 2  ;;  %v918_v61 = vunpack.c.h.bf16 %v925_v49 }
  0xa1   : > { %v436_v20 = vadd.f32 %v406_v9, %v405_v10  ;;  %v431_v41 = vadd.f32 %v430_v30, %v429_v19  ;;  %v426_v55 = vadd.f32 %v425_v40, %v424_v29 }
  0xa2   : > { %v367_v63 = vpop.permute.xlu1 %366  ;;  %v362_v0 = vpop.permute.xlu0 %361  ;;  %v419_v62 = vadd.f32 %v418_v50, %v417_v38 }
  0xa3   : > { %v408_v14 = vmul.f32 %v906_v3, %v367_v63  ;;  %v407_v15 = vmul.f32 %v905_v4, %v362_v0  ;;  %v437_v22 = vrot.slane %v436_v20, 4  ;;  %v432_v52 = vrot.slane %v431_v41, 2 }
  0xa4   : > { %v427_v2 = vrot.slane %v426_v55, 1  ;;  %v420_v9 = vrot.slane %v419_v62, 1 }
  0xa5   : > { %v443_v26 = vadd.f32 %v408_v14, %v407_v15  ;;  %v438_v42 = vadd.f32 %v437_v22, %v436_v20  ;;  %v433_v63 = vadd.f32 %v432_v52, %v431_v41 }
  0xa6   : > { %v372_v11 = vpop.permute.xlu1 %371  ;;  %v555_v12 = vpop.permute.xlu0 %554  ;;  %v428_v15 = vadd.f32 %v427_v2, %v426_v55 }
  0xa7   : > { %v409_v33 = vmul.f32 %v909_v24, %v372_v11  ;;  %v444_v37 = vrot.slane %v443_v26, 4  ;;  %v439_v56 = vrot.slane %v438_v42, 2  ;;  %v434_v11 = vrot.slane %v433_v63, 1 }
  0xa8   : > { %v421_v24 = vadd.f32 %v420_v9, %v419_v62 }
  0xa9   : > { %v445_v48 = vadd.f32 %v444_v37, %v443_v26  ;;  %v440_v3 = vadd.f32 %v439_v56, %v438_v42  ;;  %v435_v27 = vadd.f32 %v434_v11, %v433_v63 }
  0xaa   : > { %v560_v21 = vpop.permute.xlu1 %559  ;;  %v565_v23 = vpop.permute.xlu0 %564 }
  0xab   : > { %1007 = vrcp.f32 %v560_v21  ;;  %v446_v59 = vrot.slane %v445_v48, 2  ;;  %v441_v16 = vrot.slane %v440_v3, 1 }
  0xac   : > { %1009 = vrcp.f32 %v555_v12 }
  0xad   : > { %1011 = vrcp.f32 %v565_v23  ;;  %v447_v5 = vadd.f32 %v446_v59, %v445_v48  ;;  %v442_v29 = vadd.f32 %v441_v16, %v440_v3  ;;  %v760_v16 = vld [vmem:[%s269_s7] sm:$0xff] }
  0xae   : > { %v570_v31 = vpop.permute.xlu1 %569  ;;  %v377_v32 = vpop.permute.xlu0 %376 }
  0xaf   : > { %v410_v34 = vmul.f32 %v910_v25, %v377_v32  ;;  %1013 = vrcp.f32 %v570_v31  ;;  %v448_v19 = vrot.slane %v447_v5, 1 }
  0xb1   : > { %v450_v39 = vadd.f32 %v410_v34, %v409_v33  ;;  %v449_v31 = vadd.f32 %v448_v19, %v447_v5 }
  0xb2   : > { %v387_v43 = vpop.permute.xlu1 %386  ;;  %v382_v44 = vpop.permute.xlu0 %381 }
  0xb3   : > { %v451_v45 = vrot.slane %v450_v39, 4  ;;  %v412_v46 = vmul.f32 %v914_v35, %v387_v43  ;;  %v411_v47 = vmul.f32 %v913_v36, %v382_v44 }
  0xb5   : > { %v457_v51 = vadd.f32 %v412_v46, %v411_v47  ;;  %v452_v57 = vadd.f32 %v451_v45, %v450_v39 }
  0xb6   : > { %v392_v53 = vpop.permute.xlu1 %391  ;;  %v575_v54 = vpop.permute.xlu0 %574 }
  0xb7   : > { %v458_v60 = vrot.slane %v457_v51, 4  ;;  %1015 = vrcp.f32 %v575_v54  ;;  %v453_v4 = vrot.slane %v452_v57, 2  ;;  %v413_v7 = vmul.f32 %v917_v58, %v392_v53 }
  0xb8   : > { %v1008_v10 = vpop.eup %1007 }
  0xb9   : > { %v459_v6 = vadd.f32 %v458_v60, %v457_v51  ;;  %v454_v17 = vadd.f32 %v453_v4, %v452_v57  ;;  %v1010_v18 = vpop.eup %1009  ;;  %v595_v25 = vmul.f32 %v1008_v10, %v428_v15  ;;  %v872_v10 = vld [vmem:[%s1313_s3] ss:$0 sm:$0xff] }
  0xba   : > { %v580_v0 = vpop.permute.xlu1 %579  ;;  %v397_v1 = vpop.permute.xlu0 %396  ;;  %v593_v30 = vmul.f32 %v1010_v18, %v421_v24 }
  0xbb   : > { %1017 = vrcp.f32 %v580_v0  ;;  %v414_v8 = vmul.f32 %v918_v61, %v397_v1  ;;  %v460_v20 = vrot.slane %v459_v6, 2  ;;  %v1012_v23 = vpop.eup %1011  ;;  %v455_v22 = vrot.slane %v454_v17, 1 }
  0xbc   : > { %v1014_v26 = vpop.eup %1013  ;;  %v597_v32 = vmul.f32 %v1012_v23, %v435_v27  ;;  %v609_v36 = vpack.c.bf16 %v595_v25, %v595_v25  ;;  %v608_v40 = vpack.c.bf16 %v593_v30, %v593_v30 }
  0xbd   : > { %v464_v12 = vadd.f32 %v414_v8, %v413_v7  ;;  %v461_v33 = vadd.f32 %v460_v20, %v459_v6  ;;  %v599_v37 = vmul.f32 %v1014_v26, %v442_v29  ;;  %v456_v41 = vadd.f32 %v455_v22, %v454_v17 }
  0xbe   : > { %v590_v13 = vpop.permute.xlu1 %589  ;;  %v585_v14 = vpop.permute.xlu0 %584  ;;  %v610_v43 = vpack.c.bf16 %v597_v32, %v597_v32  ;;  %v648_v46 = vunpack.c.l.b16 %v609_v36  ;;  %v647_v50 = vunpack.c.l.b16 %v608_v40 }
  0xbf   : > { %1019 = vrcp.f32 %v590_v13  ;;  %v465_v21 = vrot.slane %v464_v12, 4  ;;  %v462_v44 = vrot.slane %v461_v33, 1  ;;  %v611_v47 = vpack.c.bf16 %v599_v37, %v599_v37 }
  0xc0   : > { %1021 = vrcp.f32 %v585_v14  ;;  %v649_v54 = vunpack.c.l.b16 %v610_v43  ;;  %v656_v59 = vsel %vm655_vm2, %v648_v46, %v647_v50 }
  0xc1   : > { %v466_v28 = vadd.f32 %v465_v21, %v464_v12  ;;  %v463_v55 = vadd.f32 %v462_v44, %v461_v33  ;;  %v650_v57 = vunpack.c.l.b16 %v611_v47 }
  0xc2   : > { %v658_v1 = vsel %vm657_vm3, %v649_v54, %v656_v59 }
  0xc3   : > { %v467_v34 = vrot.slane %v466_v28, 2  ;;  %v660_v3 = vsel %vm659_vm4, %v650_v57, %v658_v1 }
  0xc4   : > { %v1016_v35 = vpop.eup %1015 }
  0xc5   : > { %v601_v38 = vmul.f32 %v1016_v35, %v449_v31  ;;  %v468_v39 = vadd.f32 %v467_v34, %v466_v28 }
  0xc7   : > { %v469_v45 = vrot.slane %v468_v39, 1  ;;  %v612_v49 = vpack.c.bf16 %v601_v38, %v601_v38 }
  0xc8   : > { %v1018_v42 = vpop.eup %1017 }
  0xc9   : > { %v603_v48 = vmul.f32 %v1018_v42, %v456_v41  ;;  %v470_v51 = vadd.f32 %v469_v45, %v468_v39  ;;  %v651_v61 = vunpack.c.l.b16 %v612_v49 }
  0xcb   : > { %v613_v52 = vpack.c.bf16 %v603_v48, %v603_v48  ;;  %v662_v5 = vsel %vm661_vm5, %v651_v61, %v660_v3 }
  0xcc   : > { %v1020_v53 = vpop.eup %1019 }
  0xcd   : > { %v1022_v56 = vpop.eup %1021  ;;  %v607_v58 = vmul.f32 %v1020_v53, %v470_v51  ;;  %v652_v63 = vunpack.c.l.b16 %v613_v52 }
  0xce   : > { %v605_v60 = vmul.f32 %v1022_v56, %v463_v55 }
  0xcf   : > { %v615_v62 = vpack.c.bf16 %v607_v58, %v607_v58  ;;  %v664_v6 = vsel %vm663_vm6, %v652_v63, %v662_v5 }
  0xd0   : > { %v614_v0 = vpack.c.bf16 %v605_v60, %v605_v60 }
  0xd1   : > { %v654_v2 = vunpack.c.l.b16 %v615_v62 }
  0xd2   : > { %v653_v4 = vunpack.c.l.b16 %v614_v0 }
  0xd4   : > { %v666_v7 = vsel %vm665_vm7, %v653_v4, %v664_v6 }
  0xd5   : > { %v668_v8 = vsel %vm667_vm8, %v654_v2, %v666_v7 }
  0xd6   : > { %v669_v9 = vpack.c.b16 %v668_v8, %v668_v8 }
  0xd8   : > { %952 = vmatmul.mubr.bf16.vlgmr.msra.gmra.mxu0 %v669_v9 }
 0x198   : > { %v753_v11 = vpop.f32.mrf.mxu0 }
 0x199   : > { %v754_v12 = vadd.f32 %v872_v10, %v753_v11 }
 0x19a   : > { %v953_v13 = vpop.f32.mrf.mxu0 }
 0x19b   : > { %1023 = vtanh.f32 %v754_v12 }
 0x19c   : > { %v756_v14 = vpop.f32.mrf.mxu0 }
 0x19e   : > { %v954_v15 = vpop.f32.mrf.mxu0 }
 0x1a8   : > { %v1024_v17 = vpop.eup %1023 }
 0x1a9   : > { %v761_v18 = vmul.f32 %v1024_v17, %v760_v16 }
 0x1ab   : > { %762 = vst [vmem:[%s251_s9] sm:$0xff] %v761_v18 }
 0x1ac   : > { %1038 = shalt.err (!%p1035_p4)
}
 0x1ad   : > { %s1039_s23 = scalar_lea.hbm %s775_s13, 128  ;;  %s1043_s26 = scalar_lea.hbm %s1315_s5, 512 }
 0x1ae   : > { %p1040_p7 = scmp.ne.s32.totalorder %s775_s13, %s1039_s23  ;;  %p1044_p10 = scmp.lt.s32.totalorder %s775_s13, %s1315_s5 }
 0x1af   : > { %p1045_p11 = scmp.lt.s32.totalorder %s1043_s26, %s1039_s23 }
 0x1b0   : > { %p1041_p8 = pnand %p1040_p7, %p1159_p5 }
 0x1b1   : > { %p1046_p12 = por %p1045_p11, %p1044_p10 }
 0x1b2   : > { %p1042_p9 = pneg %p1041_p8 }
 0x1b4   : > { %p1047_p13 = pnand %p1046_p12, %p1042_p9 }
 0x1b6   : > { %1050 = shalt.err (!%p1047_p13)
}
 0x1b7   : > { %955 = dma.vmem_to_hbm [thread:$0]  (%p1159_p5), %s778_s10, 128, %s775_s13, %s764_s14  }
 0x1b8 PF: > { %p961_p0 = scmp.ge.s32.totalorder %s1085_s21, 2  ;;  %s789_s8 = sand.u32 1, %s1073_s18  }
 0x1b9   : > { %s790_s9 = scalar_lea.sflag [#allocation3], %s789_s8 }
 0x1ba   : > { %p958_p1 = pnand %p961_p0, %p1163_p6 }
 0x1bc   : > { %p959_p2 = pneg %p958_p1 }
 0x1be   : > { %1068 = dma.done.wait (%p959_p2), %s790_s9, 128  }
 0x1bf   : > { %1070 = vsyncadd (%p959_p2), %s790_s9, 4294967168  ;;  %p15_p3 = scmp.ge.s32.totalorder %s1146_s24, 6   ;;  %s1318_s18 = smov %s1077_s19 }
 0x1c0   : > { %s1319_s19 = smov %s1081_s20  ;;  %s1320_s20 = smov %s1157_s27 }
 0x1c1   : > { %s1321_s21 = smov %s1146_s24  ;;  %17 = sbr.rel (!%p15_p3) target bundleno = 3 (0x3), region = 81 }
 0x1c6   :  { %795 = vsyncpa [#allocation3], 1 }
 0x1c7   :  { %797 = vsyncpa [#allocation3 + $0x1], 1 }

</bundles_post_ra>
